<compile_context>
chip_gen: v5e
topology: v5e:2x2
jax: 0.10.0
libtpu: 0.0.40
codegen_flags: <defaults>
</compile_context>

<pallas_src>
import functools

import jax
import jax.numpy as jnp
from jax.experimental import pallas as pl
from jax.experimental.pallas import tpu as pltpu


def _side_cnn_kernel(x_ref, w_ref, gamma_ref, beta_ref, o_ref, *, eps, residual):
    """Single-program kernel; everything fits comfortably in VMEM.

    x_ref     : (B, C_in, L)        input, NCL (as nn.Conv1d sees it)
    w_ref     : (C_out, 3*C_in)     fused conv taps [W_k0 | W_k1 | W_k2]
    gamma_ref : (C_out, 1)          BN weight
    beta_ref  : (C_out, 1)          BN bias
    o_ref     : (B, C_out, L)       output, NCL
    """
    B, C_in, L = x_ref.shape
    C_out = w_ref.shape[0]
    f32 = jnp.float32

    # Per-sample padded segment length: lane multiple, >= L+1 so every segment has
    # at least one trailing zero column (this is what makes the circular rolls
    # below behave like zero-padded shifts for the valid positions).
    LP = ((L + 1 + 127) // 128) * 128
    N = B * LP

    # ---- Build the zero-padded, batch-concatenated slab (C_in, B*LP).
    # Data of sample b sits at lane-aligned offset b*LP .. b*LP+L-1; the rest is 0.
    zpad = jnp.zeros((C_in, LP - L), f32)
    segs = []
    for b in range(B):                      # B is small and static
        segs += [x_ref[b], zpad]
    x_flat = jnp.concatenate(segs, axis=1)  # (C_in, N)

    # ---- Conv1d(kernel_size=3, stride=1, padding=1) as ONE MXU matmul:
    #        out[:, p] = W_k0 @ x[p-1] + W_k1 @ x[p] + W_k2 @ x[p+1]
    # The +-1 shifts are circular rolls; wraparound only ever lands zeros (or
    # touches pad positions that are masked / never written out).
    xm = pltpu.roll(x_flat, shift=1, axis=1)        # x[p-1]   (tap k=0)
    xp = pltpu.roll(x_flat, shift=N - 1, axis=1)    # x[p+1]   (tap k=2)
    x_cat = jnp.concatenate([xm, x_flat, xp], axis=0)           # (3*C_in, N)
    y = jnp.dot(w_ref[...], x_cat, preferred_element_type=f32)  # (C_out, N)
    # conv bias omitted: a per-channel constant is cancelled exactly by the BN
    # mean subtraction below (and the module zero-initialises it).

    # ---- BatchNorm1d, training-mode batch statistics over the B*L valid positions.
    # Lane validity mask built once as (1, N) and broadcast over channels.
    pos = jax.lax.broadcasted_iota(jnp.int32, (1, N), 1)
    valid = pos < L                                       # segment b = 0
    for b in range(1, B):
        valid = valid | ((pos >= b * LP) & (pos < b * LP + L))

    n = float(B * L)
    ym = jnp.where(valid, y, 0.0)
    mean = jnp.sum(ym, axis=1, keepdims=True) / n                 # (C_out, 1)
    d = jnp.where(valid, y - mean, 0.0)                           # two-pass variance
    var = jnp.sum(d * d, axis=1, keepdims=True) / n               # (C_out, 1)
    scale = jax.lax.rsqrt(var + eps) * gamma_ref[...]             # (C_out, 1)
    y = (y - mean) * scale + beta_ref[...]

    # ---- activation (ReLU)
    y = jnp.maximum(y, 0.0)

    # ---- residual add (requires C_out == C_in, as in the PyTorch module)
    if residual:
        y = y + x_flat

    # ---- Dropout1d: identity (see TODO(synk) at top of file)

    # ---- write the valid (lane-aligned) positions back out as (B, C_out, L)
    for b in range(B):
        o_ref[b, :, :] = y[:, b * LP: b * LP + L]


def side_cnn_layer_forward(x, conv_weight, bn_gamma, bn_beta, *, eps=1e-5,
                           residual=True):
    """Forward of `side_cnn_layer` (ReLU activation, BatchNorm on, dropout=identity).

    x           : (B, C_in, L)   NCL input, as nn.Conv1d expects
    conv_weight : (C_out, C_in, 3)  PyTorch Conv1d weight layout
    bn_gamma    : (C_out,)       BatchNorm1d weight
    bn_beta     : (C_out,)       BatchNorm1d bias
    returns     : (B, C_out, L)  float32
    """
    B, C_in, L = x.shape
    C_out = conv_weight.shape[0]
    if residual and C_out != C_in:
        raise ValueError("residual add requires output_size == input_size")

    # Fuse the 3 conv taps into one (C_out, 3*C_in) matrix: [W_k0 | W_k1 | W_k2].
    w_cat = jnp.transpose(conv_weight, (0, 2, 1)).reshape(C_out, 3 * C_in)

    return pl.pallas_call(
        functools.partial(_side_cnn_kernel, eps=eps, residual=residual),
        out_shape=jax.ShapeDtypeStruct((B, C_out, L), jnp.float32),
        in_specs=[pl.BlockSpec(memory_space=pltpu.MemorySpace.VMEM)] * 4,
        out_specs=pl.BlockSpec(memory_space=pltpu.MemorySpace.VMEM),
    )(
        x.astype(jnp.float32),
        w_cat.astype(jnp.float32),
        jnp.reshape(bn_gamma, (C_out, 1)).astype(jnp.float32),
        jnp.reshape(bn_beta, (C_out, 1)).astype(jnp.float32),
    )


if __name__ == "__main__":
    B, C, L = 2, 8, 128          # batch, input_size == output_size, length

    key = jax.random.PRNGKey(0)
    kx, kw = jax.random.split(key)

    # input in NCL layout, as the module's forward receives it
    x = jax.random.normal(kx, (B, C, L), dtype=jnp.float32)

    # Conv1d weight (C_out, C_in, 3) with xavier_uniform_; bias is zero-init
    fan_in, fan_out = C * 3, C * 3
    bound = (6.0 / (fan_in + fan_out)) ** 0.5
    w = jax.random.uniform(kw, (C, C, 3), jnp.float32, -bound, bound)

    # BatchNorm1d affine params (PyTorch defaults)
    gamma = jnp.ones((C,), jnp.float32)
    beta = jnp.zeros((C,), jnp.float32)

    out = side_cnn_layer_forward(x, w, gamma, beta)
    jax.block_until_ready(out)
    assert out.shape == (B, C, L) and out.dtype == jnp.float32

    # pure-JAX reference: conv(k=3,p=1) -> BN(batch stats) -> ReLU -> + residual
    xpad = jnp.pad(x, ((0, 0), (0, 0), (1, 1)))
    conv = sum(jnp.einsum("oi,bil->bol", w[:, :, k], xpad[:, :, k:k + L],
                          precision="highest") for k in range(3))
    mean = conv.mean(axis=(0, 2), keepdims=True)
    var = ((conv - mean) ** 2).mean(axis=(0, 2), keepdims=True)
    ref = jnp.maximum((conv - mean) * jax.lax.rsqrt(var + 1e-5), 0.0) + x
    assert jnp.allclose(out, ref, atol=5e-3, rtol=5e-3)

    print("KERNEL_OK")
</pallas_src>

<mosaic_0001>
module attributes {stable_mosaic.version = 11 : i64} {
  func.func @_side_cnn_kernel(%arg0: memref<2x8x128xf32, #tpu.memory_space<vmem>>, %arg1: memref<8x24xf32, #tpu.memory_space<vmem>>, %arg2: memref<8x1xf32, #tpu.memory_space<vmem>>, %arg3: memref<8x1xf32, #tpu.memory_space<vmem>>, %arg4: memref<2x8x128xf32, #tpu.memory_space<vmem>>) attributes {dimension_semantics = [], scalar_prefetch = 0 : i64, scratch_operands = 0 : i64, tpu.core_type = #tpu.core_type<tc>} {
    %cst = arith.constant 0.000000e+00 : f32
    %0 = vector.broadcast %cst : f32 to vector<8x128xf32>
    %c0 = arith.constant 0 : index
    %c0_0 = arith.constant 0 : index
    %c0_1 = arith.constant 0 : index
    %1 = vector.load %arg0[%c0, %c0_0, %c0_1] : memref<2x8x128xf32, #tpu.memory_space<vmem>>, vector<1x8x128xf32>
    %2 = vector.shape_cast %1 : vector<1x8x128xf32> to vector<8x128xf32>
    %c1 = arith.constant 1 : index
    %c0_2 = arith.constant 0 : index
    %c0_3 = arith.constant 0 : index
    %3 = vector.load %arg0[%c1, %c0_2, %c0_3] : memref<2x8x128xf32, #tpu.memory_space<vmem>>, vector<1x8x128xf32>
    %4 = vector.shape_cast %3 : vector<1x8x128xf32> to vector<8x128xf32>
    %5 = tpu.concatenate %2, %0, %4, %0 in 1 : vector<8x128xf32>, vector<8x128xf32>, vector<8x128xf32>, vector<8x128xf32> -> vector<8x512xf32>
    %c1_i32 = arith.constant 1 : i32
    %6 = tpu.dynamic_rotate %5 by %c1_i32 dim 1 : vector<8x512xf32>, i32 -> vector<8x512xf32>
    %c511_i32 = arith.constant 511 : i32
    %7 = tpu.dynamic_rotate %5 by %c511_i32 dim 1 : vector<8x512xf32>, i32 -> vector<8x512xf32>
    %8 = tpu.concatenate %6, %5, %7 in 0 : vector<8x512xf32>, vector<8x512xf32>, vector<8x512xf32> -> vector<24x512xf32>
    %c0_4 = arith.constant 0 : index
    %c0_5 = arith.constant 0 : index
    %9 = vector.load %arg1[%c0_4, %c0_5] : memref<8x24xf32, #tpu.memory_space<vmem>>, vector<8x24xf32>
    %cst_6 = arith.constant dense<0.000000e+00> : vector<8x512xf32>
    %10 = tpu.matmul %9, %8, %cst_6 {dimension_numbers = #tpu.dot_dimension_numbers<[1], [0], [0], [1], [0, 0, 1, 1], [], []>} : vector<8x24xf32>, vector<24x512xf32>, vector<8x512xf32> -> vector<8x512xf32>
    %11 = tpu.iota {dimensions = array<i32: 1>} : vector<1x512xi32>
    %c128_i32 = arith.constant 128 : i32
    %12 = vector.broadcast %c128_i32 : i32 to vector<1x512xi32>
    %13 = arith.cmpi slt, %11, %12 : vector<1x512xi32>
    %c256_i32 = arith.constant 256 : i32
    %14 = vector.broadcast %c256_i32 : i32 to vector<1x512xi32>
    %15 = arith.cmpi sge, %11, %14 : vector<1x512xi32>
    %c384_i32 = arith.constant 384 : i32
    %16 = vector.broadcast %c384_i32 : i32 to vector<1x512xi32>
    %17 = arith.cmpi slt, %11, %16 : vector<1x512xi32>
    %18 = arith.andi %15, %17 : vector<1x512xi1>
    %19 = arith.ori %13, %18 : vector<1x512xi1>
    %cst_7 = arith.constant 0.000000e+00 : f32
    %20 = vector.shape_cast %19 : vector<1x512xi1> to vector<1x512xi1>
    %21 = vector.broadcast %20 : vector<1x512xi1> to vector<8x512xi1>
    %22 = vector.broadcast %cst_7 : f32 to vector<8x512xf32>
    %23 = arith.select %21, %10, %22 : vector<8x512xi1>, vector<8x512xf32>
    %cst_8 = arith.constant dense<0.000000e+00> : vector<8xf32>
    %24 = vector.multi_reduction <add>, %23, %cst_8 [1] : vector<8x512xf32> to vector<8xf32>
    %25 = vector.shape_cast %24 : vector<8xf32> to vector<8x1xf32>
    %cst_9 = arith.constant 2.560000e+02 : f32
    %26 = vector.broadcast %cst_9 : f32 to vector<8x1xf32>
    %27 = arith.divf %25, %26 : vector<8x1xf32>
    %28 = vector.broadcast %27 : vector<8x1xf32> to vector<8x512xf32>
    %29 = arith.subf %10, %28 : vector<8x512xf32>
    %cst_10 = arith.constant 0.000000e+00 : f32
    %30 = vector.shape_cast %19 : vector<1x512xi1> to vector<1x512xi1>
    %31 = vector.broadcast %30 : vector<1x512xi1> to vector<8x512xi1>
    %32 = vector.broadcast %cst_10 : f32 to vector<8x512xf32>
    %33 = arith.select %31, %29, %32 : vector<8x512xi1>, vector<8x512xf32>
    %34 = arith.mulf %33, %33 : vector<8x512xf32>
    %cst_11 = arith.constant dense<0.000000e+00> : vector<8xf32>
    %35 = vector.multi_reduction <add>, %34, %cst_11 [1] : vector<8x512xf32> to vector<8xf32>
    %36 = vector.shape_cast %35 : vector<8xf32> to vector<8x1xf32>
    %cst_12 = arith.constant 2.560000e+02 : f32
    %37 = vector.broadcast %cst_12 : f32 to vector<8x1xf32>
    %38 = arith.divf %36, %37 : vector<8x1xf32>
    %cst_13 = arith.constant 9.99999974E-6 : f32
    %39 = vector.broadcast %cst_13 : f32 to vector<8x1xf32>
    %40 = arith.addf %38, %39 : vector<8x1xf32>
    %41 = math.rsqrt %40 : vector<8x1xf32>
    %c0_14 = arith.constant 0 : index
    %c0_15 = arith.constant 0 : index
    %42 = vector.load %arg2[%c0_14, %c0_15] : memref<8x1xf32, #tpu.memory_space<vmem>>, vector<8x1xf32>
    %43 = arith.mulf %41, %42 : vector<8x1xf32>
    %44 = vector.broadcast %27 : vector<8x1xf32> to vector<8x512xf32>
    %45 = arith.subf %10, %44 : vector<8x512xf32>
    %46 = vector.broadcast %43 : vector<8x1xf32> to vector<8x512xf32>
    %47 = arith.mulf %45, %46 : vector<8x512xf32>
    %c0_16 = arith.constant 0 : index
    %c0_17 = arith.constant 0 : index
    %48 = vector.load %arg3[%c0_16, %c0_17] : memref<8x1xf32, #tpu.memory_space<vmem>>, vector<8x1xf32>
    %49 = vector.broadcast %48 : vector<8x1xf32> to vector<8x512xf32>
    %50 = arith.addf %47, %49 : vector<8x512xf32>
    %cst_18 = arith.constant 0.000000e+00 : f32
    %51 = vector.broadcast %cst_18 : f32 to vector<8x512xf32>
    %52 = arith.maximumf %50, %51 : vector<8x512xf32>
    %53 = arith.addf %52, %5 : vector<8x512xf32>
    %54 = vector.extract_strided_slice %53 {offsets = [0, 0], sizes = [8, 128], strides = [1, 1]} : vector<8x512xf32> to vector<8x128xf32>
    %c0_19 = arith.constant 0 : index
    %c0_20 = arith.constant 0 : index
    %c0_21 = arith.constant 0 : index
    %55 = vector.load %arg4[%c0_19, %c0_20, %c0_21] : memref<2x8x128xf32, #tpu.memory_space<vmem>>, vector<1x8x128xf32>
    %56 = vector.shape_cast %55 : vector<1x8x128xf32> to vector<8x128xf32>
    %57 = vector.shape_cast %54 : vector<8x128xf32> to vector<1x8x128xf32>
    tpu.vector_store %arg4[%c0_19, %c0_20, %c0_21], %57 {strides = array<i32>} : memref<2x8x128xf32, #tpu.memory_space<vmem>>, vector<1x8x128xf32>,
    %58 = vector.extract_strided_slice %53 {offsets = [0, 256], sizes = [8, 128], strides = [1, 1]} : vector<8x512xf32> to vector<8x128xf32>
    %c1_22 = arith.constant 1 : index
    %c0_23 = arith.constant 0 : index
    %c0_24 = arith.constant 0 : index
    %59 = vector.load %arg4[%c1_22, %c0_23, %c0_24] : memref<2x8x128xf32, #tpu.memory_space<vmem>>, vector<1x8x128xf32>
    %60 = vector.shape_cast %59 : vector<1x8x128xf32> to vector<8x128xf32>
    %61 = vector.shape_cast %58 : vector<8x128xf32> to vector<1x8x128xf32>
    tpu.vector_store %arg4[%c1_22, %c0_23, %c0_24], %61 {strides = array<i32>} : memref<2x8x128xf32, #tpu.memory_space<vmem>>, vector<1x8x128xf32>,
    return
  }
}

</mosaic_0001>

<bundles_post_ra>
// kernel: tpu_custom_call.1
= control target key start
LH: loop header
LB: loop body
LE: loop exit
PB: predicated region body
PF: predicated region fallthrough
CT: control target
= control target key end

     0   :  { %9 = vsyncpa [#allocation3], 0  ;;  %s409_s0 = inlined_call_operand.vmem [shape: f32[2,8,128], index: 0, kind: input, shape index: {}]   ;;  %s410_s1 = inlined_call_operand.hbm [shape: f32[8,24], index: 1, kind: input, shape index: {}]   ;;  %s411_s2 = inlined_call_operand.vmem [shape: f32[8,1], index: 2, kind: input, shape index: {}]   ;;  %s412_s3 = inlined_call_operand.vmem [shape: f32[8,1], index: 3, kind: input, shape index: {}]   ;;  %s413_s4 = inlined_call_operand.hbm [shape: f32[2,8,128], index: 4, kind: output, shape index: {}]  }
   0x1   :  { %10 = vsyncpa [#allocation4], 0  ;;  %s18_s17 = sshll.u32 %s410_s1, 4  ;;  %s346_s18 = smov [#allocation2]   ;;  %s19_s17 = int_to_ptr.hbm [resolvable:$true] %s18_s17 }
   0x2   :  { %s20_s19 = sshll.u32 %s346_s18, 4  ;;  %s21_s19 = int_to_ptr.vmem [resolvable:$true] %s20_s19 }
   0x3   :  { %23 = dma.hbm_to_vmem [thread:$0]  %s19_s17, 128, %s21_s19, [#allocation3]  }
   0x4   :  { %342 = dma.done.wait [#allocation3], 128  }
   0x5   :  { %343 = vsyncadd [#allocation3], 4294967168  ;;  %v386_v0 = vld [vmem:[%s409_s0 + $0x8] sm:$0xff]  ;;  %v391_v1 = vld [vmem:[%s409_s0] sm:$0xff]  ;;  %v347_v2 = vmov 0.0   ;;  %s348_s1 = smov 127   ;;  %v41_v4 = vlaneseq }
   0x6   :  { %v278_v3 = vpack.i.bf16 %v386_v0, %v347_v2  ;;  %48 = vrot.lane.b32.xlu1 %v391_v1, %s348_s1  ;;  %s349_s24 = smov 1   ;;  %vm60_vm2 = vcmask 195584   ;;  %v59_v22 = vld [vmem:[#allocation2] sm:$0xff]  ;;  %v350_v28 = vmov 256.0   ;;  %v351_v42 = vmov 0   ;;  %s251_s5 = sshll.u32 %s413_s4, 4  ;;  %s252_s5 = int_to_ptr.hbm [resolvable:$true] %s251_s5 }
   0x7   :  { %v42_v5 = vand.u32 127, %v41_v4  ;;  %290 = vrcp.f32 %v350_v28  ;;  %288 = vset.pattern.permute.xlu0 %v351_v42  ;;  %289 = vset.pattern.permute.xlu1 %v351_v42  ;;  %v230_v43 = vld [vmem:[%s412_s3] sm:$0xff]  ;;  %s352_s3 = smov [#allocation5]   ;;  %s354_s6 = smov 8  }
   0x8   :  { %279 = vrot.lane.b32.xlu0 %v278_v3, %s348_s1  ;;  %v221_v53 = vld [vmem:[%s411_s2] sm:$0xff]  ;;  %s249_s28 = sshll.u32 %s352_s3, 4  ;;  %s353_s2 = smov 128   ;;  %s250_s28 = int_to_ptr.vmem [resolvable:$true] %s249_s28 }
   0x9   :  { %vm54_vm0 = vcmp.lt.s32.totalorder %v42_v5, 127  ;;  %vm43_vm1 = vcmp.lt.s32.totalorder %v42_v5, 1 }
   0xd   :  { %v291_v29 = vpop.eup %290 }
   0xe   :  { %35 = vrot.lane.b32.xlu1 %v391_v1, %s349_s24  ;;  %v185_v30 = vmul.f32 256.0, %v291_v29  ;;  %vm189_vm3 = vweird.f32 %v291_v29 }
  0x10   :  { %284 = vrot.lane.b32.xlu0 %v278_v3, %s349_s24  ;;  %v186_v31 = vsub.f32 1.0, %v185_v30 }
  0x12   :  { %v187_v32 = vmul.f32 %v291_v29, %v186_v31 }
  0x14   :  { %v188_v33 = vadd.f32 %v291_v29, %v187_v32 }
  0x16   :  { %v190_v34 = vsel %vm189_vm3, %v291_v29, %v188_v33  ;;  %233 = vperm.xlu1 %289, %v230_v43  }
  0x78   :  { %v49_v6 = vpop.permute.xlu1 %48 }
  0x7a   :  { %v280_v7 = vpop.permute.xlu0 %279 }
  0x7b   :  { %v282_v8 = vunpack.i.h.bf16 %v280_v7  ;;  %v281_v9 = vunpack.i.l.bf16 %v280_v7 }
  0x7d   :  { %v57_v10 = vsel %vm54_vm0, %v49_v6, %v281_v9  ;;  %v56_v11 = vsel %vm54_vm0, %v281_v9, %v282_v8  ;;  %v55_v12 = vsel %vm54_vm0, %v282_v8, %v281_v9  ;;  %v58_v13 = vsel %vm54_vm0, %v281_v9, %v49_v6 }
  0x7e   :  { %77 = vmatpush.msra.mxu0 %v57_v10  ;;  %97 = vmatpush.msra.mxu1 %v56_v11 }
  0x7f   :  { %117 = vmatpush.msra.mxu2 %v55_v12  ;;  %137 = vmatpush.msra.mxu3 %v58_v13 }
  0x80   :  { %78 = vmatpush.msra.mxu0 %v391_v1  ;;  %98 = vmatpush.msra.mxu1 %v347_v2  ;;  %v36_v15 = vpop.permute.xlu1 %35 }
  0x81   :  { %118 = vmatpush.msra.mxu2 %v386_v0  ;;  %138 = vmatpush.msra.mxu3 %v347_v2 }
  0x82   :  { %v285_v14 = vpop.permute.xlu0 %284 }
  0x83   :  { %v287_v16 = vunpack.i.h.bf16 %v285_v14  ;;  %v286_v17 = vunpack.i.l.bf16 %v285_v14 }
  0x85   :  { %v47_v18 = vsel %vm43_vm1, %v286_v17, %v36_v15  ;;  %v46_v19 = vsel %vm43_vm1, %v36_v15, %v286_v17  ;;  %v45_v20 = vsel %vm43_vm1, %v286_v17, %v287_v16  ;;  %v44_v21 = vsel %vm43_vm1, %v287_v16, %v286_v17 }
  0x86   :  { %79 = vmatpush.msra.mxu0 %v47_v18  ;;  %99 = vmatpush.msra.mxu1 %v46_v19 }
  0x87   :  { %119 = vmatpush.msra.mxu2 %v45_v20  ;;  %139 = vmatpush.msra.mxu3 %v44_v21 }
  0x88   :  { %267 = vmatmul.msk.f32.vlgmr.msra.gmra.mxu2 %vm60_vm2, %v59_v22  ;;  %265 = vmatmul.msk.f32.vlgmr.msra.gmra.mxu0 %vm60_vm2, %v59_v22  ;;  %v234_v57 = vpop.permute.xlu1 %233 }
  0x89   :  { %268 = vmatmul.msk.f32.vlgmr.msra.gmra.mxu3 %vm60_vm2, %v59_v22  ;;  %266 = vmatmul.msk.f32.vlgmr.msra.gmra.mxu1 %vm60_vm2, %v59_v22 }
 0x105   :  { %v81_v24 = vpop.f32.mrf.mxu0 }
 0x106   :  { %v101_v23 = vpop.f32.mrf.mxu1 }
 0x10b   :  { %v121_v25 = vpop.f32.mrf.mxu2 }
 0x10c   :  { %v180_v26 = vadd.f32 %v121_v25, %v81_v24  ;;  %v141_v27 = vpop.f32.mrf.mxu3 }
 0x10e   :  { %182 = vadd.xlane.f32.xlu2 %v180_v26 }
 0x181   :  { %v183_v35 = vpop.xlane.xlu2 %182 }
 0x182   :  { %v191_v36 = vmul.f32 %v190_v34, %v183_v35 }
 0x184   :  { %v192_v37 = vsub.f32 %v81_v24, %v191_v36  ;;  %v194_v38 = vsub.f32 %v121_v25, %v191_v36 }
 0x186   :  { %v200_v39 = vmul.f32 %v192_v37, %v192_v37  ;;  %v202_v40 = vmul.f32 %v194_v38, %v194_v38 }
 0x188   :  { %v205_v41 = vadd.f32 %v202_v40, %v200_v39 }
 0x18a   :  { %207 = vadd.xlane.f32.xlu2 %v205_v41 }
 0x1fd   :  { %v208_v44 = vpop.xlane.xlu2 %207 }
 0x1fe   :  { %v209_v45 = vmul.f32 %v208_v44, %v190_v34 }
 0x200   :  { %v210_v46 = vadd.f32 1e-05, %v209_v45 }
 0x202   :  { %292 = vrsqrt.f32 %v210_v46  ;;  %vm217_vm5 = vweird.f32 %v210_v46 }
 0x208   :  { %v293_v47 = vpop.eup %292 }
 0x209   :  { %v212_v48 = vmul.f32 %v293_v47, %v210_v46  ;;  %vm218_vm4 = vweird.f32 %v293_v47 }
 0x20a   :  { %vm219_vm6 = vmor %vm217_vm5, %vm218_vm4 }
 0x20b   :  { %v213_v49 = vmul.f32 %v293_v47, %v212_v48 }
 0x20d   :  { %v214_v50 = vmul.f32 0.5, %v213_v49 }
 0x20f   :  { %v215_v51 = vsub.f32 1.5, %v214_v50 }
 0x211   :  { %v216_v52 = vmul.f32 %v293_v47, %v215_v51 }
 0x213   :  { %v220_v54 = vsel %vm219_vm6, %v293_v47, %v216_v52 }
 0x214   :  { %v222_v55 = vmul.f32 %v221_v53, %v220_v54 }
 0x216   :  { %225 = vperm.xlu0 %288, %v222_v55  }
 0x288   :  { %v226_v56 = vpop.permute.xlu0 %225 }
 0x289   :  { %v228_v58 = vmul.f32 %v226_v56, %v192_v37  ;;  %v229_v59 = vmul.f32 %v226_v56, %v194_v38 }
 0x28b   :  { %v236_v60 = vadd.f32 %v234_v57, %v228_v58  ;;  %v237_v61 = vadd.f32 %v234_v57, %v229_v59 }
 0x28d   :  { %v238_v62 = vmax.f32 %v236_v60, 0.0  ;;  %v239_v63 = vmax.f32 %v237_v61, 0.0 }
 0x28f   :  { %v240_v2 = vadd.f32 %v238_v62, %v391_v1  ;;  %v241_v3 = vadd.f32 %v386_v0, %v239_v63 }
 0x291   :  { %242 = vst [vmem:[#allocation5] sm:$0xff] %v240_v2 }
 0x292   :  { %244 = vst [vmem:[#allocation5 + $0x8] sm:$0xff] %v241_v3 }
 0x293   :  { %257 = dma.vmem_to_hbm [thread:$0]  %s250_s28, 256, %s252_s5, [#allocation4], %s353_s2, %s353_s2, %s354_s6  }
 0x294   :  { %344 = dma.done.wait [#allocation4], 256  }
 0x295   :  { %345 = vsyncadd [#allocation4], 4294967040 }
 0x296   :  { %262 = vsyncpa [#allocation3], 1 }
 0x297   :  { %263 = vsyncpa [#allocation4], 1 }

</bundles_post_ra>
